<compile_context>
chip_gen: v7x
topology: tpu7x:2x2x1
jax: 0.10.0
libtpu: 0.0.40
codegen_flags: <defaults>
</compile_context>

<pallas_src>
import math

import jax
import jax.numpy as jnp
from jax.experimental import pallas as pl
from jax.experimental.pallas import tpu as pltpu


def _srelu_kernel(x_ref, b_ref, o_ref):
    # relu(x - b) + b == max(x, b); bias broadcast (over lanes or sublanes,
    # depending on layout) happens once per block inside the VPU.
    o_ref[...] = jnp.maximum(x_ref[...], b_ref[...]).astype(o_ref.dtype)


def _vmem_capacity_bytes() -> int:
    try:
        cap = getattr(pltpu.get_tpu_info(), "vmem_capacity_bytes", None)
        if cap:
            return int(cap)
    except Exception:
        pass
    return 64 << 20  # conservative (v7x-sized) fallback


def _generation_params():
    """(target block bytes, vmem_limit_bytes) sized per TPU generation."""
    cap = _vmem_capacity_bytes()
    if cap >= (100 << 20):   # v5e / v6e: 128 MiB VMEM, single TensorCore
        return 8 << 20, 64 << 20
    # v7x-like: 64 MiB VMEM, 2 TensorCores -> keep blocks / scoped limit bounded
    return 6 << 20, 48 << 20


def _pick_row_block(num_rows: int, C: int, row_bytes: int,
                    target_bytes: int) -> int:
    """Row block: multiple of lcm(8, C) (sublane-aligned AND channel-periodic,
    so the (rb, 1) bias block is identical for every block), or the full row
    extent for tiny inputs."""
    L = (8 * C) // math.gcd(8, C)
    if num_rows <= L:
        return num_rows                      # full extent (always legal)
    rb = max(L, (target_bytes // max(1, row_bytes)) // L * L)
    return min(rb, (num_rows // L) * L)


def _pick_col_block(S: int, rb: int, itemsize: int, target_bytes: int,
                    want_split: bool) -> int:
    """Lane block: multiple of 128 (keeps stores unmasked), or full extent if
    S is not 128-aligned.  Splits to bound block bytes and/or to guarantee
    >= 2 grid steps for megacore sharding."""
    if S % 128 != 0 or S <= 128:
        return S
    chunks = max(1, -(-(rb * S * itemsize) // target_bytes))  # ceil div
    if want_split:
        chunks = max(chunks, 2)
    if chunks == 1:
        return S
    return max(128, (S // chunks) // 128 * 128)


def srelu(x: jax.Array, bias: jax.Array) -> jax.Array:
    """Shifted ReLU. x: [B, C, *spatial] (or [B, C]), bias: [C]."""
    orig_shape = x.shape
    C = x.shape[1]
    assert bias.shape == (C,)
    itemsize = x.dtype.itemsize
    target_bytes, vmem_limit = _generation_params()

    if x.ndim == 2:
        # Lane-density guard: put channels on the lane axis; bias is a single
        # (1, C) row broadcast down the sublanes.
        B = x.shape[0]
        if B > 8 and B % 8 == 0:
            rb = min(B, max(8, (target_bytes // max(1, C * itemsize)) // 8 * 8))
        else:
            rb = B
        row_steps = pl.cdiv(B, rb)
        cb = _pick_col_block(C, rb, itemsize, target_bytes,
                             want_split=(row_steps == 1))
        grid = (row_steps, pl.cdiv(C, cb))
        bias_row = bias.astype(x.dtype).reshape(1, C)
        return pl.pallas_call(
            _srelu_kernel,
            out_shape=jax.ShapeDtypeStruct((B, C), x.dtype),
            grid=grid,
            in_specs=[
                pl.BlockSpec((rb, cb), lambda i, j: (i, j)),
                pl.BlockSpec((1, cb), lambda i, j: (0, j)),  # row-invariant bias
            ],
            out_specs=pl.BlockSpec((rb, cb), lambda i, j: (i, j)),
            compiler_params=pltpu.CompilerParams(
                dimension_semantics=("parallel", "parallel"),
                vmem_limit_bytes=vmem_limit,
            ),
            cost_estimate=pl.CostEstimate(
                flops=x.size, transcendentals=0,
                bytes_accessed=2 * x.size * itemsize + C * itemsize),
        )(x, bias_row)

    # ndim >= 3: lane-dense [B*C, S] view, per-row bias column.
    B = x.shape[0]
    S = math.prod(x.shape[2:])
    R = B * C
    x2 = x.reshape(R, S)

    rb = _pick_row_block(R, C, S * itemsize, target_bytes)
    row_steps = pl.cdiv(R, rb)
    # TODO(synk): if S is not a multiple of 128 the stores fall back to masked
    # vst.msk partial stores; fixing that needs HBM-side padding of the spatial
    # extent or fusing SReLU into the producer/consumer kernel.
    sb = _pick_col_block(S, rb, itemsize, target_bytes,
                         want_split=(row_steps == 1))
    grid = (row_steps, pl.cdiv(S, sb))

    # Grid-invariant bias block: rb % C == 0, so one (rb, 1) column covers the
    # per-row bias pattern of every row block (row r within a block -> bias[r % C]).
    reps = rb // C  # rb is either R (= B*C) or a multiple of lcm(8, C)
    bias_col = jnp.tile(bias.astype(x.dtype), reps).reshape(rb, 1)

    out2 = pl.pallas_call(
        _srelu_kernel,
        out_shape=jax.ShapeDtypeStruct((R, S), x.dtype),
        grid=grid,
        in_specs=[
            pl.BlockSpec((rb, sb), lambda i, j: (i, j)),   # x tile (lane-dense)
            pl.BlockSpec((rb, 1), lambda i, j: (0, 0)),    # grid-invariant bias
        ],
        out_specs=pl.BlockSpec((rb, sb), lambda i, j: (i, j)),
        compiler_params=pltpu.CompilerParams(
            dimension_semantics=("parallel", "parallel"),
            vmem_limit_bytes=vmem_limit,
        ),
        cost_estimate=pl.CostEstimate(
            flops=x.size, transcendentals=0,
            bytes_accessed=2 * x.size * itemsize + rb * itemsize),
    )(x2, bias_col)

    return out2.reshape(orig_shape)


def _ref(x, bias):
    # Plain-JAX reference with the original PyTorch formula's semantics.
    bview = bias.astype(x.dtype).reshape((1, -1) + (1,) * (x.ndim - 2))
    return jnp.maximum(x - bview, 0.0) + bview


if __name__ == "__main__":
    key = jax.random.PRNGKey(0)
    k1, k2, k3 = jax.random.split(key, 3)

    # Primary shape implied by the module: [batch, channels, H, W].
    B, C, H, W = 2, 4, 16, 16
    x = jax.random.normal(k1, (B, C, H, W), dtype=jnp.float32)
    bias = jnp.full((C,), -1.0, dtype=jnp.float32)  # nn.init.constant_(bias, -1.0)
    out = jax.block_until_ready(srelu(x, bias))
    assert out.shape == x.shape and out.dtype == x.dtype
    assert jnp.allclose(out, _ref(x, bias), atol=1e-6)

    # Non-128-aligned spatial extent + odd channel count (partial-block /
    # masked-store fallback path).
    x_b = jax.random.normal(k2, (3, 5, 7, 9), dtype=jnp.float32)
    bias_b = jnp.linspace(-1.0, 1.0, 5, dtype=jnp.float32)
    out_b = jax.block_until_ready(srelu(x_b, bias_b))
    assert jnp.allclose(out_b, _ref(x_b, bias_b), atol=1e-6)

    # 2-D input path (channels on the lane axis).
    x_c = jax.random.normal(k3, (8, 32), dtype=jnp.float32)
    bias_c = jnp.full((32,), -1.0, dtype=jnp.float32)
    out_c = jax.block_until_ready(srelu(x_c, bias_c))
    assert jnp.allclose(out_c, _ref(x_c, bias_c), atol=1e-6)

    print("KERNEL_OK")
</pallas_src>

<mosaic_0001>
module attributes {stable_mosaic.version = 11 : i64} {
  func.func @_srelu_kernel(%arg0: i32, %arg1: i32, %arg2: memref<8x128xf32, #tpu.memory_space<vmem>>, %arg3: memref<8x1xf32, #tpu.memory_space<vmem>>, %arg4: memref<8x128xf32, #tpu.memory_space<vmem>>) attributes {dimension_semantics = [#tpu.dimension_semantics<parallel>, #tpu.dimension_semantics<parallel>], iteration_bounds = array<i64: 1, 2>, scalar_prefetch = 0 : i64, scratch_operands = 0 : i64, tpu.core_type = #tpu.core_type<tc>, window_params = [{transform_indices = @transform_0, window_bounds = array<i64: 8, 128>}, {pipeline_mode = #tpu.pipeline_mode<synchronous>, transform_indices = @transform_1, window_bounds = array<i64: 8, 1>}, {transform_indices = @transform_2, window_bounds = array<i64: 8, 128>}]} {
    %c0 = arith.constant 0 : index
    %c0_0 = arith.constant 0 : index
    %0 = vector.load %arg2[%c0, %c0_0] : memref<8x128xf32, #tpu.memory_space<vmem>>, vector<8x128xf32>
    %c0_1 = arith.constant 0 : index
    %c0_2 = arith.constant 0 : index
    %1 = vector.load %arg3[%c0_1, %c0_2] : memref<8x1xf32, #tpu.memory_space<vmem>>, vector<8x1xf32>
    %2 = vector.broadcast %1 : vector<8x1xf32> to vector<8x128xf32>
    %3 = arith.maximumf %0, %2 : vector<8x128xf32>
    %c0_3 = arith.constant 0 : index
    %c0_4 = arith.constant 0 : index
    %4 = vector.load %arg4[%c0_3, %c0_4] : memref<8x128xf32, #tpu.memory_space<vmem>>, vector<8x128xf32>
    tpu.vector_store %arg4[%c0_3, %c0_4], %3 {strides = array<i32>} : memref<8x128xf32, #tpu.memory_space<vmem>>, vector<8x128xf32>,
    return
  }
  func.func @transform_0(%arg0: i32, %arg1: i32) -> (i32, i32) {
    %c0_i32 = arith.constant 0 : i32
    return %arg0, %arg1 : i32, i32
  }
  func.func @transform_1(%arg0: i32, %arg1: i32) -> (i32, i32) {
    %c0_i32 = arith.constant 0 : i32
    %c0_i32_0 = arith.constant 0 : i32
    %c0_i32_1 = arith.constant 0 : i32
    return %c0_i32, %c0_i32_0 : i32, i32
  }
  func.func @transform_2(%arg0: i32, %arg1: i32) -> (i32, i32) {
    %c0_i32 = arith.constant 0 : i32
    return %arg0, %arg1 : i32, i32
  }
}

</mosaic_0001>

<bundles_post_ra>
// kernel: tpu_custom_call.1
= control target key start
LH: loop header
LB: loop body
LE: loop exit
PB: predicated region body
PF: predicated region fallthrough
CT: control target
= control target key end

     0   :  { %7 = vsyncpa [#allocation3], 0  ;;  %s668_s0 = inlined_call_operand.hbm [shape: f32[8,256], index: 0, kind: input, shape index: {}]   ;;  %s669_s1 = inlined_call_operand.vmem [shape: f32[8,1], index: 1, kind: input, shape index: {}]   ;;  %s670_s2 = inlined_call_operand.hbm [shape: f32[8,256], index: 2, kind: output, shape index: {}]  }
   0x1   :  { %9 = vsyncpa [#allocation3 + $0x1], 0 }
   0x2   :  { %10 = vsyncpa [#allocation4], 0 }
   0x3   :  { %12 = vsyncpa [#allocation4 + $0x1], 0  ;;  %s493_s9 = smov 0   ;;  %s495_s10 = smov 0  }
   0x4   :  { %s497_s11 = smov 0   ;;  %s499_s12 = smov 0  }
   0x5   :  { %s501_s13 = smov 0   ;;  %s503_s14 = smov 0  }
   0x6 LB: > { %s284_s15 = sadd.s32 4294967295, %s473_s14   ;;  %s285_s16 = sadd.s32 4294967294, %s473_s14   ;;  %s473_s14 = sphi %s503_s14, %s18_s14   ;;  %s469_s13 = sphi %s501_s13, %s686_s13   ;;  %s465_s12 = sphi %s499_s12, %s685_s12   ;;  %s461_s11 = sphi %s497_s11, %s684_s11   ;;  %s457_s10 = sphi %s495_s10, %s683_s10   ;;  %s453_s9 = sphi %s493_s9, %s682_s9  }
   0x7   : > { %s27_s17 = sadd.s32 1, %s469_s13  ;;  %s39_s18 = sadd.s32 1, %s461_s11 }
   0x8   : > { %p28_p0 = scmp.ge.s32.totalorder %s27_s17, 2  ;;  %p46_p1 = scmp.ne.s32.totalorder %s461_s11, %s457_s10 }
   0x9   : > { %p47_p2 = scmp.eq.s32.totalorder %s473_s14, 0  ;;  %p52_p3 = scmp.ne.s32.totalorder %s457_s10, %s453_s9 }
   0xa   : > { %s688_s17 = smov (%p28_p0, %s27_s17), 0  ;;  %p53_p5 = scmp.eq.s32.totalorder %s284_s15, 0 }
   0xb   : > { %p534_p4 = por %p47_p2, %p46_p1  ;;  %s35_s20 = ssub.s32 %s469_s13, %s688_s17 }
   0xc   : > { %p99_p6 = scmp.eq.s32.totalorder %s284_s15, 1  ;;  %p37_p7 = scmp.eq.s32.totalorder %s35_s20, 0 }
   0xd   : > { %p540_p8 = por %p53_p5, %p52_p3  ;;  %p105_p10 = scmp.eq.s32.totalorder %s285_s16, 1 }
   0xe   : > { %p544_p9 = por %p99_p6, %p46_p1  ;;  %p309_p13 = scmp.lt.s32.totalorder %s473_s14, 2 }
   0xf   : > { %s549_s23 = scalar_select %p37_p7, %s461_s11, %s39_s18  }
  0x10   : > { %s674_s22 = scalar_select %p544_p9, 1, 0 }
  0x11   : > { %p551_p11 = por %p105_p10, %p52_p3  ;;  %s128_s25 = sand.u32 1, %s461_s11  }
  0x12   : > { %s288_s26 = sshll.u32 %s128_s25, 3  ;;  %s289_s27 = sshll.u32 %s469_s13, 7 }
  0x13   : > { %s675_s24 = scalar_select %p551_p11, 1, 0 }
  0x14   : > { %s562_s30 = scalar_lea.hbm %s668_s0, %s289_s27  ;;  %s132_s3 = scalar_lea.vmem [#allocation2], %s288_s26 }
  0x15   : > { %s141_s4 = sshll.u32 %s132_s3, 4  ;;  %p568_p0 = pnand %p309_p13, %p534_p4  ;;  %s564_s4 = int_to_ptr.vmem [resolvable:$true] %s141_s4 }
  0x16   : > { %s129_s6 = scalar_lea.sflag [#allocation3], %s128_s25  ;;  %s361_s7 = scalar_lea.hbm %s562_s30, 128 }
  0x17   : > { %p362_p3 = scmp.ne.s32.totalorder %s562_s30, %s361_s7  ;;  %p363_p5 = pneg %p568_p0 }
  0x18   : > { %s366_s16 = scalar_lea.hbm %s668_s0, 256  ;;  %p367_p4 = scmp.lt.u32.totalorder %s562_s30, %s668_s0 }
  0x19   : > { %p364_p6 = pnand %p363_p5, %p362_p3  ;;  %p368_p10 = scmp.lt.u32.totalorder %s366_s16, %s361_s7 }
  0x1a   : > { %p370_p12 = scmp.lt.u32.totalorder %s361_s7, %s562_s30 }
  0x1b   : > { %p365_p7 = pneg %p364_p6  ;;  %p369_p13 = por %p368_p10, %p367_p4 }
  0x1d   : > { %p371_p1 = por %p370_p12, %p369_p13 }
  0x1f   : > { %p372_p2 = pnand %p371_p1, %p365_p7 }
  0x21   : > { %375 = shalt.err (!%p372_p2)
}
  0x22   : > { %s376_s20 = scalar_lea.vmem %s564_s4, 128  ;;  %s475_s25 = smov [#allocation2]  }
  0x23   : > { %p377_p3 = scmp.ne.s32.totalorder %s564_s4, %s376_s20  ;;  %s381_s26 = sshll.u32 %s475_s25, 4  ;;  %s382_s26 = int_to_ptr.vmem [resolvable:$false] %s381_s26 }
  0x24   : > { %s383_s27 = scalar_lea.vmem %s382_s26, 256  ;;  %p384_p9 = scmp.lt.s32.totalorder %s564_s4, %s382_s26 }
  0x25   : > { %p379_p6 = pnand %p377_p3, %p363_p5  ;;  %p385_p4 = scmp.lt.s32.totalorder %s383_s27, %s376_s20 }
  0x27   : > { %p380_p11 = pneg %p379_p6  ;;  %p386_p10 = por %p385_p4, %p384_p9 }
  0x29   : > { %p387_p12 = pnand %p386_p10, %p380_p11 }
  0x2b   : > { %390 = shalt.err (!%p387_p12)
}
  0x2c   : > { %304 = dma.hbm_to_vmem [thread:$0]  (!%p568_p0), %s562_s30, 128, %s564_s4, %s129_s6  }
  0x2d   : > { %p677_p1 = scmp.lt.s32.totalorder %s473_s14, 3  ;;  %p678_p2 = scmp.ge.s32.totalorder %s473_s14, 1 }
  0x2f   : > { %p147_p5 = pnand %p678_p2, %p677_p1 }
  0x30   : > { %s604_s28 = sand.u32 (!%p147_p5), 1, %s457_s10  }
  0x31   : > { %150 = sbr.rel (%p147_p5) target bundleno = 203 (0xcb), region = 28  ;;  %s291_s29 = sshll.u32 (!%p147_p5), %s604_s28, 3 }
  0x32   : > { %s153_s3 = scalar_lea.sflag (!%p147_p5), [#allocation3], %s604_s28  ;;  %s156_s7 = scalar_lea.vmem (!%p147_p5), [#allocation2], %s291_s29 }
  0x38   : > { %444 = dma.done.wait (%p540_p8), %s153_s3, 128  }
  0x39   : > { %446 = vsyncadd (%p540_p8), %s153_s3, 4294967168  ;;  %v476_v0 = vmov 0   ;;  %v178_v1 = vld [vmem:[%s669_s1] sm:$0xff]  ;;  %s294_s5 = sshll.u32 %s465_s12, 7  ;;  %s176_s6 = scalar_lea.vmem [#allocation5], %s291_s29 }
  0x3a   : > { %360 = vset.pattern.permute.xlu0 %v476_v0  ;;  %v177_v2 = vld [vmem:[%s156_s7] sm:$0xff]  ;;  %s202_s8 = sshll.u32 %s176_s6, 4  ;;  %s619_s21 = scalar_lea.hbm %s670_s2, %s294_s5  ;;  %s621_s8 = int_to_ptr.vmem [resolvable:$true] %s202_s8 }
  0x3b   : > { %181 = vperm.xlu0 %360, %v178_v1   ;;  %s187_s18 = scalar_lea.sflag [#allocation4], %s604_s28  ;;  %s391_s19 = scalar_lea.vmem %s621_s8, 128 }
  0x3c   : > { %p392_p8 = scmp.ne.s32.totalorder %s621_s8, %s391_s19  ;;  %p679_p9 = scmp.ne.s32.totalorder %s674_s22, 0 }
  0x3d   : > { %s477_s12 = smov [#allocation5]  }
  0x3e   : > { %p393_p11 = pnand %p392_p8, %p679_p9  ;;  %s395_s20 = sshll.u32 %s477_s12, 4  ;;  %s396_s20 = int_to_ptr.vmem [resolvable:$false] %s395_s20 }
  0x3f   : > { %s397_s25 = scalar_lea.vmem %s396_s20, 256  ;;  %p398_p7 = scmp.lt.s32.totalorder %s621_s8, %s396_s20 }
  0x40   : > { %p394_p0 = pneg %p393_p11  ;;  %p399_p13 = scmp.lt.s32.totalorder %s397_s25, %s391_s19 }
  0x42   : > { %p400_p3 = por %p399_p13, %p398_p7 }
  0x44   : > { %p401_p6 = pnand %p400_p3, %p394_p0 }
  0xba   : > { %v182_v3 = vpop.permute.xlu0 %181 }
  0xbb   : > { %v184_v4 = vmax.f32 %v177_v2, %v182_v3 }
  0xbd   : > { %185 = vst [vmem:[%s176_s6] sm:$0xff] %v184_v4 }
  0xbe   : > { %404 = shalt.err (!%p401_p6)
}
  0xbf   : > { %s405_s26 = scalar_lea.hbm %s619_s21, 128  ;;  %s409_s29 = scalar_lea.hbm %s670_s2, 256 }
  0xc0   : > { %p406_p4 = scmp.ne.s32.totalorder %s619_s21, %s405_s26  ;;  %p410_p1 = scmp.lt.u32.totalorder %s619_s21, %s670_s2 }
  0xc1   : > { %p411_p2 = scmp.lt.u32.totalorder %s409_s29, %s405_s26  ;;  %p413_p8 = scmp.lt.u32.totalorder %s405_s26, %s619_s21 }
  0xc2   : > { %p407_p10 = pnand %p406_p4, %p679_p9 }
  0xc3   : > { %p412_p5 = por %p411_p2, %p410_p1 }
  0xc4   : > { %p408_p12 = pneg %p407_p10 }
  0xc5   : > { %p414_p11 = por %p413_p8, %p412_p5 }
  0xc7   : > { %p415_p0 = pnand %p414_p11, %p408_p12 }
  0xc9   : > { %418 = shalt.err (!%p415_p0)
}
  0xca   : > { %299 = dma.vmem_to_hbm [thread:$0]  (%p679_p9), %s621_s8, 128, %s619_s21, %s187_s18  }
  0xcb PF: > { %s214_s30 = sand.u32 1, %s453_s9   ;;  %p680_p7 = scmp.ne.s32.totalorder %s675_s24, 0 }
  0xcc   : > { %p681_p13 = scmp.ge.s32.totalorder %s473_s14, 2  ;;  %s215_s4 = scalar_lea.sflag [#allocation4], %s214_s30 }
  0xce   : > { %p306_p3 = pnand %p681_p13, %p680_p7 }
  0xd0   : > { %448 = dma.done.wait (!%p306_p3), %s215_s4, 128  }
  0xd1   : > { %450 = vsyncadd (!%p306_p3), %s215_s4, 4294967168  ;;  %s18_s14 = sadd.s32 1, %s473_s14   ;;  %s682_s9 = smov %s457_s10 }
  0xd2   : > { %p15_p6 = scmp.ge.s32.totalorder %s18_s14, 4   ;;  %s683_s10 = smov %s461_s11 }
  0xd3   : > { %s684_s11 = smov %s549_s23  ;;  %s685_s12 = smov %s469_s13 }
  0xd4   : > { %s686_s13 = smov %s688_s17  ;;  %17 = sbr.rel (!%p15_p6) target bundleno = 6 (0x6), region = 73 }
  0xdb   :  { %220 = vsyncpa [#allocation3], 1 }
  0xdc   :  { %222 = vsyncpa [#allocation3 + $0x1], 1 }
  0xdd   :  { %223 = vsyncpa [#allocation4], 1 }
  0xde   :  { %225 = vsyncpa [#allocation4 + $0x1], 1 }

</bundles_post_ra>
